<compile_context>
chip_gen: v7x
topology: tpu7x:2x2x1
jax: 0.10.0
libtpu: 0.0.40
codegen_flags: <defaults>
</compile_context>

<pallas_src>
import jax
import jax.numpy as jnp
from jax.experimental import pallas as pl
from jax.experimental.pallas import tpu as pltpu

# ---- module hyper-parameters (PyTorch defaults) ------------------------------
NET_WIDTH = 32
INPUT_SIZE = 4
OUTPUT_SIZE = 1
NEG_SLOPE = 0.01       # torch.nn.LeakyReLU default
NORM_EPS = 1e-12       # torch.nn.functional.normalize default

# ---- packed-parameter slab: single (32, 128) f32 array, one DMA --------------
LANE = 128
PARAM_ROWS = NET_WIDTH                         # 32 rows (multiple of 8 sublanes)
PARAM_COLS = LANE                              # 128 lanes
_W2_COL = 0                                    # [:, 0:32]   W2 (32, 32)
_W1_COL = _W2_COL + NET_WIDTH                  # [:, 32:36]  W1 (32, 4)
_B1_COL = _W1_COL + INPUT_SIZE                 # [:, 36]     b1 (32,)
_B2_COL = _B1_COL + 1                          # [:, 37]     b2 (32,)
_W3_COL = _B2_COL + 1                          # [:, 38]     final-layer row as column
_B3_COL = _W3_COL + 1                          # [:, 39]     b3 scalar (replicated)

_SINGLE_TILE_MAX = 256   # lane-padded batch <= this -> single no-grid call
_TB = 256                # lane tile for the batched grid path


def _round_up(n, m):
    return ((n + m - 1) // m) * m


def _leaky(x):
    return jnp.where(x >= 0, x, NEG_SLOPE * x)


def actor_kernel(p_ref, xt_ref, o_ref):
    """p_ref: (32,128) packed params; xt_ref: (4, TB) batch-on-lanes; o_ref: (1, TB)."""
    # Static slices of the single packed parameter block.
    w2 = p_ref[:, _W2_COL:_W2_COL + NET_WIDTH]          # (32, 32)
    w1 = p_ref[:, _W1_COL:_W1_COL + INPUT_SIZE]         # (32, 4)
    b1 = p_ref[:, _B1_COL:_B1_COL + 1]                  # (32, 1)
    b2 = p_ref[:, _B2_COL:_B2_COL + 1]                  # (32, 1)
    w3 = p_ref[:, _W3_COL:_W3_COL + 1]                  # (32, 1)
    b3 = p_ref[0:1, _B3_COL:_B3_COL + 1]                # (1, 1)

    xt = xt_ref[...]                                    # (4, TB), f32

    # first_layer + LeakyReLU   (batch on lanes, features on sublanes)
    h = jnp.dot(w1, xt, preferred_element_type=jnp.float32) + b1     # (32, TB)
    h = _leaky(h)

    # inter_layer + LeakyReLU
    h = jnp.dot(w2, h, preferred_element_type=jnp.float32) + b2      # (32, TB)
    h = _leaky(h)

    # final_layer (output_size == 1): VPU multiply + sublane reduce, no 1-wide
    # MXU matmul.
    y = jnp.sum(h * w3, axis=0, keepdims=True) + b3                  # (1, TB)

    # F.normalize over a feature dim of size 1 degenerates to y / max(|y|, eps).
    o_ref[...] = (y / jnp.maximum(jnp.abs(y), NORM_EPS)).astype(o_ref.dtype)


def actor_forward(x, param_slab):
    """x: (B, 4) f32 observations; param_slab: (32, 128) packed params. Returns (B, 1)."""
    x = x.astype(jnp.float32)
    B = x.shape[0]

    b128 = _round_up(B, LANE)
    if b128 <= _SINGLE_TILE_MAX:
        tb, b_pad, num_tiles = b128, b128, 1
    else:
        tb = _TB
        b_pad = _round_up(B, tb)
        num_tiles = b_pad // tb

    # Transpose so the batch sits on the lane axis, pad lanes to the tile size.
    xt = jnp.pad(x.T, ((0, 0), (0, b_pad - B)))          # (4, B_pad)
    out_shape = jax.ShapeDtypeStruct((1, b_pad), jnp.float32)

    if num_tiles == 1:
        # Single invocation, no grid bookkeeping: whole arrays resident in VMEM.
        yt = pl.pallas_call(
            actor_kernel,
            out_shape=out_shape,
            in_specs=[
                pl.BlockSpec(memory_space=pltpu.MemorySpace.VMEM),
                pl.BlockSpec(memory_space=pltpu.MemorySpace.VMEM),
            ],
            out_specs=pl.BlockSpec(memory_space=pltpu.MemorySpace.VMEM),
        )(param_slab, xt)
    else:
        # Lane-tiled batch; "parallel" lets v7x shard tiles across both TCs.
        yt = pl.pallas_call(
            actor_kernel,
            out_shape=out_shape,
            grid=(num_tiles,),
            in_specs=[
                pl.BlockSpec((PARAM_ROWS, PARAM_COLS), lambda i: (0, 0)),
                pl.BlockSpec((INPUT_SIZE, tb), lambda i: (0, i)),
            ],
            out_specs=pl.BlockSpec((1, tb), lambda i: (0, i)),
            compiler_params=pltpu.CompilerParams(
                dimension_semantics=("parallel",)),
        )(param_slab, xt)

    return yt[0, :B][:, None]                             # (B, 1), matches PyTorch


def init_actor_params(key, net_width=NET_WIDTH, input_size=INPUT_SIZE,
                      output_size=OUTPUT_SIZE):
    """torch.nn.Linear-style init; weights kept in PyTorch (out, in) layout."""
    ks = jax.random.split(key, 6)

    def lin(kw, kb, fan_in, fan_out):
        bound = float(fan_in) ** -0.5
        w = jax.random.uniform(kw, (fan_out, fan_in), jnp.float32, -bound, bound)
        b = jax.random.uniform(kb, (fan_out,), jnp.float32, -bound, bound)
        return w, b

    w1, b1 = lin(ks[0], ks[1], input_size, net_width)
    w2, b2 = lin(ks[2], ks[3], net_width, net_width)
    w3, b3 = lin(ks[4], ks[5], net_width, output_size)
    return (w1, b1, w2, b2, w3, b3)


def pack_params(params):
    """Pack all six parameter tensors into one (32, 128) f32 slab (single DMA)."""
    w1, b1, w2, b2, w3, b3 = params
    slab = jnp.zeros((PARAM_ROWS, PARAM_COLS), jnp.float32)
    slab = slab.at[:NET_WIDTH, _W2_COL:_W2_COL + NET_WIDTH].set(w2)
    slab = slab.at[:NET_WIDTH, _W1_COL:_W1_COL + INPUT_SIZE].set(w1)
    slab = slab.at[:NET_WIDTH, _B1_COL].set(b1)
    slab = slab.at[:NET_WIDTH, _B2_COL].set(b2)
    slab = slab.at[:NET_WIDTH, _W3_COL].set(w3[0])    # final-layer weights as column
    slab = slab.at[:NET_WIDTH, _B3_COL].set(b3[0])    # scalar bias replicated
    return slab


def actor_reference(x, params):
    """Pure-JAX reference (high-precision matmuls). Returns (normalized, pre-norm y)."""
    w1, b1, w2, b2, w3, b3 = params
    h = _leaky(jnp.dot(x, w1.T, precision="highest") + b1)
    h = _leaky(jnp.dot(h, w2.T, precision="highest") + b2)
    y = jnp.dot(h, w3.T, precision="highest") + b3
    n = jnp.sqrt(jnp.sum(y * y, axis=1, keepdims=True))
    return y / jnp.maximum(n, NORM_EPS), y


def _check(x, param_slab, params):
    out = jax.block_until_ready(actor_forward(x, param_slab))
    ref, y_ref = actor_reference(x, params)
    assert out.shape == (x.shape[0], OUTPUT_SIZE), out.shape
    # F.normalize of a size-1 feature dim is ~sign(y); the sign is numerically
    # ill-conditioned where y ~ 0, so only require agreement away from that region.
    ok = (jnp.abs(out - ref) <= 1e-5) | (jnp.abs(y_ref) <= 1e-3)
    assert bool(jnp.all(ok)), (out, ref)
    return out


if __name__ == "__main__":
    key = jax.random.PRNGKey(0)
    kp, kx1, kx2 = jax.random.split(key, 3)

    params = init_actor_params(kp)
    param_slab = pack_params(params)      # pack once, reuse across calls

    # Small batch -> single-tile, no-grid path.
    x_small = jax.random.normal(kx1, (8, INPUT_SIZE), jnp.float32)
    _check(x_small, param_slab, params)

    # Larger batch -> lane-tiled "parallel" grid path (2 tiles of 256 lanes).
    x_large = jax.random.normal(kx2, (384, INPUT_SIZE), jnp.float32)
    _check(x_large, param_slab, params)

    print("KERNEL_OK")
</pallas_src>

<mosaic_0001>
module attributes {stable_mosaic.version = 11 : i64} {
  func.func @actor_kernel(%arg0: memref<32x128xf32, #tpu.memory_space<vmem>>, %arg1: memref<4x128xf32, #tpu.memory_space<vmem>>, %arg2: memref<1x128xf32, #tpu.memory_space<vmem>>) attributes {dimension_semantics = [], scalar_prefetch = 0 : i64, scratch_operands = 0 : i64, tpu.core_type = #tpu.core_type<tc>} {
    %c0 = arith.constant 0 : index
    %c0_0 = arith.constant 0 : index
    %0 = vector.load %arg0[%c0, %c0_0] : memref<32x128xf32, #tpu.memory_space<vmem>>, vector<32x32xf32>
    %c0_1 = arith.constant 0 : index
    %c32 = arith.constant 32 : index
    %1 = vector.load %arg0[%c0_1, %c32] : memref<32x128xf32, #tpu.memory_space<vmem>>, vector<32x4xf32>
    %c0_2 = arith.constant 0 : index
    %c36 = arith.constant 36 : index
    %2 = vector.load %arg0[%c0_2, %c36] : memref<32x128xf32, #tpu.memory_space<vmem>>, vector<32x1xf32>
    %c0_3 = arith.constant 0 : index
    %c37 = arith.constant 37 : index
    %3 = vector.load %arg0[%c0_3, %c37] : memref<32x128xf32, #tpu.memory_space<vmem>>, vector<32x1xf32>
    %c0_4 = arith.constant 0 : index
    %c38 = arith.constant 38 : index
    %4 = vector.load %arg0[%c0_4, %c38] : memref<32x128xf32, #tpu.memory_space<vmem>>, vector<32x1xf32>
    %c0_5 = arith.constant 0 : index
    %c39 = arith.constant 39 : index
    %5 = vector.load %arg0[%c0_5, %c39] : memref<32x128xf32, #tpu.memory_space<vmem>>, vector<1x1xf32>
    %c0_6 = arith.constant 0 : index
    %c0_7 = arith.constant 0 : index
    %6 = vector.load %arg1[%c0_6, %c0_7] : memref<4x128xf32, #tpu.memory_space<vmem>>, vector<4x128xf32>
    %cst = arith.constant dense<0.000000e+00> : vector<32x128xf32>
    %7 = tpu.matmul %1, %6, %cst {dimension_numbers = #tpu.dot_dimension_numbers<[1], [0], [0], [1], [0, 0, 1, 1], [], []>} : vector<32x4xf32>, vector<4x128xf32>, vector<32x128xf32> -> vector<32x128xf32>
    %8 = vector.broadcast %2 : vector<32x1xf32> to vector<32x128xf32>
    %9 = arith.addf %7, %8 : vector<32x128xf32>
    %cst_8 = arith.constant 0.000000e+00 : f32
    %10 = vector.broadcast %cst_8 : f32 to vector<32x128xf32>
    %11 = arith.cmpf oge, %9, %10 : vector<32x128xf32>
    %cst_9 = arith.constant 0.00999999977 : f32
    %12 = vector.broadcast %cst_9 : f32 to vector<32x128xf32>
    %13 = arith.mulf %12, %9 : vector<32x128xf32>
    %14 = arith.select %11, %9, %13 : vector<32x128xi1>, vector<32x128xf32>
    %cst_10 = arith.constant dense<0.000000e+00> : vector<32x128xf32>
    %15 = tpu.matmul %0, %14, %cst_10 {dimension_numbers = #tpu.dot_dimension_numbers<[1], [0], [0], [1], [0, 0, 1, 1], [], []>} : vector<32x32xf32>, vector<32x128xf32>, vector<32x128xf32> -> vector<32x128xf32>
    %16 = vector.broadcast %3 : vector<32x1xf32> to vector<32x128xf32>
    %17 = arith.addf %15, %16 : vector<32x128xf32>
    %cst_11 = arith.constant 0.000000e+00 : f32
    %18 = vector.broadcast %cst_11 : f32 to vector<32x128xf32>
    %19 = arith.cmpf oge, %17, %18 : vector<32x128xf32>
    %cst_12 = arith.constant 0.00999999977 : f32
    %20 = vector.broadcast %cst_12 : f32 to vector<32x128xf32>
    %21 = arith.mulf %20, %17 : vector<32x128xf32>
    %22 = arith.select %19, %17, %21 : vector<32x128xi1>, vector<32x128xf32>
    %23 = vector.broadcast %4 : vector<32x1xf32> to vector<32x128xf32>
    %24 = arith.mulf %22, %23 : vector<32x128xf32>
    %cst_13 = arith.constant dense<0.000000e+00> : vector<128xf32>
    %25 = vector.multi_reduction <add>, %24, %cst_13 [0] : vector<32x128xf32> to vector<128xf32>
    %26 = vector.shape_cast %25 : vector<128xf32> to vector<1x128xf32>
    %27 = vector.broadcast %5 : vector<1x1xf32> to vector<1x128xf32>
    %28 = arith.addf %26, %27 : vector<1x128xf32>
    %29 = math.absf %28 : vector<1x128xf32>
    %cst_14 = arith.constant 9.99999996E-13 : f32
    %30 = vector.broadcast %cst_14 : f32 to vector<1x128xf32>
    %31 = arith.maximumf %29, %30 : vector<1x128xf32>
    %32 = arith.divf %28, %31 : vector<1x128xf32>
    %c0_15 = arith.constant 0 : index
    %c0_16 = arith.constant 0 : index
    %33 = vector.load %arg2[%c0_15, %c0_16] : memref<1x128xf32, #tpu.memory_space<vmem>>, vector<1x128xf32>
    tpu.vector_store %arg2[%c0_15, %c0_16], %32 {strides = array<i32>} : memref<1x128xf32, #tpu.memory_space<vmem>>, vector<1x128xf32>,
    return
  }
}

</mosaic_0001>

<bundles_post_ra>
// kernel: tpu_custom_call.1
= control target key start
LH: loop header
LB: loop body
LE: loop exit
PB: predicated region body
PF: predicated region fallthrough
CT: control target
= control target key end

     0   :  { %7 = vsyncpa [#allocation3], 0  ;;  %s587_s0 = inlined_call_operand.hbm [shape: f32[32,128], index: 0, kind: input, shape index: {}]   ;;  %s588_s1 = inlined_call_operand.hbm [shape: f32[4,128], index: 1, kind: input, shape index: {}]   ;;  %s589_s2 = inlined_call_operand.hbm [shape: f32[1,128], index: 2, kind: output, shape index: {}]  }
   0x1   :  { %8 = vsyncpa [#allocation6], 0 }
   0x2   :  { %9 = vsyncpa [#allocation4], 0  ;;  %s508_s9 = smov [#allocation2]   ;;  %s436_s13 = scalar_lea.hbm %s587_s0, 512 }
   0x3   :  { %s15_s10 = sshll.u32 %s508_s9, 4  ;;  %p437_p0 = scmp.ne.s32.totalorder %s587_s0, %s436_s13  ;;  %s16_s10 = int_to_ptr.vmem [resolvable:$true] %s15_s10 }
   0x4   :  { %p440_p1 = scmp.lt.u32.totalorder %s436_s13, %s587_s0 }
   0x6   :  { %p442_p2 = pnand %p440_p1, %p437_p0 }
   0x8   :  { %445 = shalt.err (!%p442_p2)
}
   0x9   :  { %s446_s18 = scalar_lea.vmem %s16_s10, 512  ;;  %p451_p4 = scmp.lt.s32.totalorder %s16_s10, %s16_s10 }
   0xa   :  { %p447_p3 = scmp.ne.s32.totalorder %s16_s10, %s446_s18  ;;  %p452_p5 = scmp.lt.s32.totalorder %s446_s18, %s446_s18 }
   0xc   :  { %p453_p6 = por %p452_p5, %p451_p4 }
   0xe   :  { %p454_p7 = pnand %p453_p6, %p447_p3 }
  0x10   :  { %457 = shalt.err (!%p454_p7)
}
  0x11   :  { %s509_s19 = smov 128   ;;  %s510_s20 = smov 8  }
  0x12   :  { %21 = dma.hbm_to_vmem [thread:$0]  %s587_s0, 512, %s16_s10, [#allocation3], %s509_s19, %s509_s19, %s510_s20  }
  0x13   :  { %s511_s23 = smov [#allocation5]   ;;  %s458_s27 = scalar_lea.hbm %s588_s1, 64 }
  0x14   :  { %s28_s24 = sshll.u32 %s511_s23, 4  ;;  %p459_p8 = scmp.ne.s32.totalorder %s588_s1, %s458_s27  ;;  %s29_s24 = int_to_ptr.vmem [resolvable:$true] %s28_s24 }
  0x15   :  { %p462_p9 = scmp.lt.u32.totalorder %s458_s27, %s588_s1 }
  0x17   :  { %p464_p10 = pnand %p462_p9, %p459_p8 }
  0x19   :  { %467 = shalt.err (!%p464_p10)
}
  0x1a   :  { %s468_s4 = scalar_lea.vmem %s29_s24, 64  ;;  %p473_p12 = scmp.lt.s32.totalorder %s29_s24, %s29_s24 }
  0x1b   :  { %p469_p11 = scmp.ne.s32.totalorder %s29_s24, %s468_s4  ;;  %p474_p13 = scmp.lt.s32.totalorder %s468_s4, %s468_s4 }
  0x1d   :  { %p475_p0 = por %p474_p13, %p473_p12 }
  0x1f   :  { %p476_p1 = pnand %p475_p0, %p469_p11 }
  0x21   :  { %479 = shalt.err (!%p476_p1)
}
  0x22   :  { %31 = dma.hbm_to_vmem [thread:$0]  %s588_s1, 64, %s29_s24, [#allocation6]  }
  0x23   :  { %502 = dma.done.wait [#allocation3], 512  }
  0x24   :  { %503 = vsyncadd [#allocation3], 4294966784 }
  0x25   :  { %504 = dma.done.wait [#allocation6], 64  }
  0x26   :  { %505 = vsyncadd [#allocation6], 4294967232  ;;  %v512_v0 = vmov 36   ;;  %vm81_vm0 = vcmask 1043456   ;;  %v38_v1 = vld [vmem:[#allocation2] sm:$0xff]  ;;  %v40_v2 = vld [vmem:[#allocation2 + $0x10] sm:$0xff] }
  0x27   :  { %427 = vset.pattern.permute.xlu1 %v512_v0  ;;  %426 = vset.pattern.permute.xlu0 %v512_v0  ;;  %s513_s6 = smov 96   ;;  %v43_v3 = vld [vmem:[#allocation5] sm:$0xf]  ;;  %v557_v4 = vld [vmem:[#allocation2 + $0x8] sm:$0xff]  ;;  %v559_v5 = vld [vmem:[#allocation2 + $0x18] sm:$0xff]  ;;  %vm72_vm1 = vcmask 31744  }
  0x28   :  { %64 = vrot.lane.b32.xlu0 %v38_v1, %s513_s6  ;;  %68 = vrot.lane.b32.xlu1 %v40_v2, %s513_s6  ;;  %vm198_vm2 = vcmask 261120   ;;  %v514_v10 = vmov 37   ;;  %v515_v11 = vmov 38   ;;  %v516_v12 = vmov 39   ;;  %v42_v13 = vld [vmem:[#allocation2] sm:$0x1] }
  0x29   :  { %382 = vmatprep.subr.msk.mxu0 %vm81_vm0, %v43_v3  ;;  %401 = vmatprep.mubr.msk.f32.mxu1 %vm198_vm2, %v40_v2  ;;  %s517_s1 = smov [#allocation7]  }
  0x2a   :  { %383 = vmatpush3.msk.msra.mxu0 %vm81_vm0, %v43_v3  ;;  %s350_s7 = sshll.u32 %s517_s1, 4  ;;  %s351_s7 = int_to_ptr.vmem [resolvable:$true] %s350_s7 }
  0x2b   :  { %s480_s8 = scalar_lea.vmem %s351_s7, 16  ;;  %s484_s9 = scalar_lea.vmem %s351_s7, 32 }
  0x2c   :  { %66 = vrot.lane.b32.xlu0 %v557_v4, %s513_s6  ;;  %70 = vrot.lane.b32.xlu1 %v559_v5, %s513_s6  ;;  %p481_p2 = scmp.ne.s32.totalorder %s351_s7, %s480_s8  ;;  %p485_p3 = scmp.lt.s32.totalorder %s351_s7, %s351_s7 }
  0x2d   :  { %p486_p4 = scmp.lt.s32.totalorder %s484_s9, %s480_s8 }
  0x2f   :  { %p487_p5 = por %p486_p4, %p485_p3 }
  0x30   :  { %51 = vperm.xlu1 %427, %v557_v4   ;;  %46 = vperm.xlu0 %426, %v38_v1  }
  0x31   :  { %p488_p6 = pnand %p487_p5, %p481_p2 }
  0x34   :  { %56 = vperm.xlu1 %427, %v40_v2   ;;  %61 = vperm.xlu0 %426, %v559_v5  }
  0x38   :  { %428 = vset.pattern.permute.xlu1 %v514_v10  ;;  %429 = vset.pattern.permute.xlu0 %v514_v10 }
  0x39   :  { %183 = vperm.xlu1 %428, %v38_v1   ;;  %187 = vperm.xlu0 %429, %v557_v4  }
  0x3d   :  { %191 = vperm.xlu1 %428, %v40_v2   ;;  %430 = vset.pattern.permute.xlu0 %v515_v11 }
  0x3e   :  { %305 = vperm.xlu0 %430, %v38_v1  }
  0x41   :  { %195 = vperm.xlu1 %428, %v559_v5  }
  0x42   :  { %317 = vperm.xlu0 %430, %v559_v5  }
  0x45   :  { %431 = vset.pattern.permute.xlu1 %v515_v11 }
  0x46   :  { %309 = vperm.xlu1 %431, %v557_v4   ;;  %433 = vset.pattern.permute.xlu0 %v516_v12 }
  0x4a   :  { %313 = vperm.xlu1 %431, %v40_v2  }
  0x4e   :  { %432 = vset.pattern.permute.xlu1 %v516_v12 }
  0x4f   :  { %335 = vperm.xlu1 %432, %v42_v13  }
  0x9a   :  { %v65_v6 = vpop.permute.xlu0 %64  ;;  %v69_v7 = vpop.permute.xlu1 %68 }
  0x9b   :  { %384 = vmatprep.mubr.msk.f32.mxu0 %vm72_vm1, %v65_v6 }
  0x9e   :  { %v67_v8 = vpop.permute.xlu0 %66  ;;  %v71_v9 = vpop.permute.xlu1 %70 }
  0x9f   :  { %385 = vmatmul.mubr.msk.f32.vlgmr.msra.gmra.mrb[0].mxu0 %vm72_vm1, %v67_v8 }
  0xa0   :  { %387 = vmatprep.mubr.msk.f32.mxu0 %vm72_vm1, %v69_v7 }
  0xa3   :  { %388 = vmatmul.mubr.msk.f32.gmra.mrb[2].mxu0 %vm72_vm1, %v71_v9 }
  0xa4   :  { %398 = vmatprep.mubr.msk.f32.mxu0 %vm198_vm2, %v38_v1 }
  0xaf   :  { %v47_v14 = vpop.permute.xlu0 %46  ;;  %v52_v15 = vpop.permute.xlu1 %51 }
  0xb3   :  { %v62_v22 = vpop.permute.xlu0 %61  ;;  %v57_v25 = vpop.permute.xlu1 %56 }
  0xb8   :  { %v184_v36 = vpop.permute.xlu1 %183  ;;  %v188_v38 = vpop.permute.xlu0 %187 }
  0xbc   :  { %v192_v37 = vpop.permute.xlu1 %191 }
  0xbd   :  { %v306_v49 = vpop.permute.xlu0 %305 }
  0xc0   :  { %v196_v39 = vpop.permute.xlu1 %195 }
  0xc1   :  { %v318_v61 = vpop.permute.xlu0 %317 }
  0xc5   :  { %v310_v46 = vpop.permute.xlu1 %309 }
  0xc9   :  { %v314_v59 = vpop.permute.xlu1 %313 }
  0xce   :  { %v336_v8 = vpop.permute.xlu1 %335 }
 0x172   :  { %v386_v16 = vpop.f32.mrb[0].mxu0 }
 0x173   :  { %v157_v17 = vadd.f32 %v386_v16, %v52_v15  ;;  %v151_v18 = vpop.f32.mrb[1].mxu0 }
 0x174   :  { %v152_v19 = vadd.f32 %v151_v18, %v47_v14 }
 0x175   :  { %vm171_vm3 = vcmp.ge.f32.partialorder %v157_v17, 0.0  ;;  %v175_v20 = vmul.f32 0.01, %v157_v17 }
 0x176   :  { %vm170_vm4 = vcmp.ge.f32.partialorder %v152_v19, 0.0  ;;  %v174_v21 = vmul.f32 0.01, %v152_v19  ;;  %v389_v23 = vpop.f32.mrb[2].mxu0 }
 0x177   :  { %v179_v24 = vsel %vm171_vm3, %v157_v17, %v175_v20  ;;  %v167_v26 = vadd.f32 %v389_v23, %v62_v22  ;;  %v161_v27 = vpop.f32.mrb[3].mxu0 }
 0x178   :  { %v178_v28 = vsel %vm170_vm4, %v152_v19, %v174_v21  ;;  %v162_v29 = vadd.f32 %v161_v27, %v57_v25 }
 0x179   :  { %v404_v30 = vpack.c.bf16 %v179_v24, %v178_v28  ;;  %vm173_vm5 = vcmp.ge.f32.partialorder %v167_v26, 0.0  ;;  %v177_v31 = vmul.f32 0.01, %v167_v26 }
 0x17a   :  { %vm172_vm6 = vcmp.ge.f32.partialorder %v162_v29, 0.0  ;;  %v176_v32 = vmul.f32 0.01, %v162_v29 }
 0x17b   :  { %v181_v33 = vsel %vm173_vm5, %v167_v26, %v177_v31  ;;  %405 = vmatprep.subr.bf16.mxu0 %v404_v30  ;;  %412 = vmatprep.subr.bf16.mxu1 %v404_v30 }
 0x17c   :  { %v180_v34 = vsel %vm172_vm6, %v162_v29, %v176_v32  ;;  %407 = vmatpush3.bf16.msra.mxu0 %v404_v30  ;;  %414 = vmatpush3.bf16.msra.mxu1 %v404_v30 }
 0x17d   :  { %v408_v35 = vpack.c.bf16 %v181_v33, %v180_v34 }
 0x17f   :  { %409 = vmatprep.subr.bf16.mxu0 %v408_v35  ;;  %413 = vmatprep.subr.bf16.mxu1 %v408_v35 }
 0x180   :  { %411 = vmatpush3.bf16.msra.mxu0 %v408_v35  ;;  %415 = vmatpush3.bf16.msra.mxu1 %v408_v35 }
 0x183   :  { %399 = vmatmul.mubr.msk.f32.vlgmr.msra.gmra.mrb[4].mxu0 %vm198_vm2, %v557_v4  ;;  %402 = vmatmul.mubr.msk.f32.vlgmr.msra.gmra.mrb[0].mxu1 %vm198_vm2, %v559_v5 }
 0x256   :  { %v400_v40 = vpop.f32.mrb[4].mxu0  ;;  %v403_v41 = vpop.f32.mrb[0].mxu1 }
 0x257   :  { %v279_v42 = vadd.f32 %v400_v40, %v188_v38  ;;  %v289_v43 = vadd.f32 %v403_v41, %v196_v39  ;;  %v273_v44 = vpop.f32.mrb[5].mxu0  ;;  %v283_v45 = vpop.f32.mrb[1].mxu1 }
 0x258   :  { %v274_v47 = vadd.f32 %v273_v44, %v184_v36  ;;  %v284_v48 = vadd.f32 %v283_v45, %v192_v37 }
 0x259   :  { %v297_v50 = vmul.f32 0.01, %v279_v42  ;;  %v299_v51 = vmul.f32 0.01, %v289_v43  ;;  %vm293_vm7 = vcmp.ge.f32.partialorder %v279_v42, 0.0  ;;  %vm295_vm10 = vcmp.ge.f32.partialorder %v289_v43, 0.0 }
 0x25a   :  { %v296_v52 = vmul.f32 0.01, %v274_v47  ;;  %v298_v53 = vmul.f32 0.01, %v284_v48  ;;  %vm292_vm8 = vcmp.ge.f32.partialorder %v274_v47, 0.0  ;;  %vm294_vm9 = vcmp.ge.f32.partialorder %v284_v48, 0.0 }
 0x25b   :  { %v301_v54 = vsel %vm293_vm7, %v279_v42, %v297_v50  ;;  %v303_v60 = vsel %vm295_vm10, %v289_v43, %v299_v51 }
 0x25c   :  { %v321_v55 = vmul.f32 %v310_v46, %v301_v54  ;;  %v300_v56 = vsel %vm292_vm8, %v274_v47, %v296_v52  ;;  %v302_v57 = vsel %vm294_vm9, %v284_v48, %v298_v53  ;;  %v323_v1 = vmul.f32 %v318_v61, %v303_v60 }
 0x25d   :  { %v320_v58 = vmul.f32 %v306_v49, %v300_v56  ;;  %v322_v63 = vmul.f32 %v314_v59, %v302_v57 }
 0x25f   :  { %v324_v62 = vadd.f32 %v321_v55, %v320_v58 }
 0x261   :  { %v325_v0 = vadd.f32 %v324_v62, %v322_v63 }
 0x263   :  { %v326_v2 = vadd.f32 %v325_v0, %v323_v1 }
 0x265   :  { %v327_v3 = vrot.slane %v326_v2, 4 }
 0x267   :  { %v328_v4 = vadd.f32 %v327_v3, %v326_v2 }
 0x269   :  { %v329_v5 = vrot.slane %v328_v4, 2 }
 0x26b   :  { %v330_v6 = vadd.f32 %v329_v5, %v328_v4 }
 0x26d   :  { %v331_v7 = vrot.slane %v330_v6, 1 }
 0x26f   :  { %v332_v9 = vadd.f32 %v331_v7, %v330_v6 }
 0x271   :  { %v338_v10 = vadd.f32 %v336_v8, %v332_v9 }
 0x273   :  { %v339_v11 = vand.u32 2147483647, %v338_v10 }
 0x275   :  { %v340_v12 = vmax.f32 %v339_v11, 1e-12 }
 0x277   :  { %434 = vrcp.f32 %v340_v12 }
 0x281   :  { %v435_v13 = vpop.eup %434 }
 0x282   :  { %v342_v14 = vmul.f32 %v435_v13, %v338_v10 }
 0x284   :  { %343 = vst [vmem:[#allocation7] sm:$0x1] %v342_v14 }
 0x285   :  { %491 = shalt.err (!%p488_p6)
}
 0x286   :  { %s492_s12 = scalar_lea.hbm %s589_s2, 16 }
 0x287   :  { %p493_p7 = scmp.ne.s32.totalorder %s589_s2, %s492_s12  ;;  %p496_p8 = scmp.lt.u32.totalorder %s492_s12, %s589_s2 }
 0x289   :  { %p498_p9 = pnand %p496_p8, %p493_p7 }
 0x28b   :  { %501 = shalt.err (!%p498_p9)
}
 0x28c   :  { %353 = dma.vmem_to_hbm [thread:$0]  %s351_s7, 16, %s589_s2, [#allocation4]  }
 0x28d   :  { %506 = dma.done.wait [#allocation4], 16  }
 0x28e   :  { %507 = vsyncadd [#allocation4], 4294967280 }
 0x28f   :  { %357 = vsyncpa [#allocation3], 1 }
 0x290   :  { %358 = vsyncpa [#allocation6], 1 }
 0x291   :  { %359 = vsyncpa [#allocation4], 1 }

</bundles_post_ra>
